<compile_context>
chip_gen: v6e
topology: v6e:2x2x1
jax: 0.10.0
libtpu: 0.0.40
codegen_flags: <defaults>
</compile_context>

<pallas_src>
import math
import functools

import jax
import jax.numpy as jnp
from jax.experimental import pallas as pl
from jax.experimental.pallas import tpu as pltpu


# ---------------------------------------------------------------------------
# Hyper-parameters (match PyTorch module defaults; deterministic, in-script).
# ---------------------------------------------------------------------------
W1 = 0.005
W2 = 0.1
W3 = 0.001
ALPHA = 0.0
BETA = 500.0
GAMMA = 0.0
DELTA = 1.5

B0 = DELTA
B1 = (W2 * GAMMA + (W1 - W2) * ALPHA) / W1
B2 = GAMMA
B3 = BETA
_TEMP = math.exp(-DELTA)
T_BETA = 1.0 / (1.0 + math.exp(-W2 * (BETA - GAMMA) - DELTA)) - _TEMP / (1.0 + _TEMP)

# Folded exponent constants:  exp(-w*(h - b) - b0) == exp((w*b - b0) - w*h)
C1 = W1 * B1 - B0
C2 = W2 * B2 - B0
C3 = W3 * B3 - B0

_LANE = 128
_TARGET_BLOCK_BYTES = 4 * 1024 * 1024    # ~4 MiB per block
_VMEM_LIMIT_BYTES = 32 * 1024 * 1024     # explicit scoped-VMEM limit (see header)


# ---------------------------------------------------------------------------
# Pallas kernel: elementwise triple-sigmoid on one (tr, width) VMEM tile.
# One EUP exp + one reciprocal per element (select-before-exp).
# ---------------------------------------------------------------------------
def _triple_sigmoid_kernel(h_ref, o_ref):
    h = h_ref[...].astype(jnp.float32)

    # Branch masks computed once (shared by both selects and the final merge).
    m1 = h < ALPHA            # branch 1:  h < alpha
    m2 = h < BETA             # branches 1 & 2:  h < beta

    # select-(w, c)-before-exp: the three branches share a single exp and a
    # single reciprocal; exponent constants are folded at trace time.
    w_sel = jnp.where(m1, W1, jnp.where(m2, W2, W3))
    c_sel = jnp.where(m1, C1, jnp.where(m2, C2, C3))

    t = jnp.exp(c_sel - w_sel * h)      # single EUP exp
    r = pl.reciprocal(1.0 + t)          # exact (approx=False) reciprocal

    # branches 1/2 -> 1/(1+t) = r ;  branch 3 -> t_beta + t/(1+t) = t_beta + t*r
    # NOTE: keep this a jnp.where per-lane select.  For very negative h the
    # unselected branch-3 expression is inf*0 = NaN; the select discards it,
    # but arithmetic masking (m*a + (1-m)*b) would propagate the NaN.
    out = jnp.where(m2, r, T_BETA + t * r)

    o_ref[...] = out.astype(o_ref.dtype)


# ---------------------------------------------------------------------------
# Pure-jnp fallback (same folded formulation) for the <128-element tail and
# for inputs smaller than one lane row.
# ---------------------------------------------------------------------------
def _triple_sigmoid_jnp(h):
    hf = h.astype(jnp.float32)
    m1 = hf < ALPHA
    m2 = hf < BETA
    w_sel = jnp.where(m1, W1, jnp.where(m2, W2, W3))
    c_sel = jnp.where(m1, C1, jnp.where(m2, C2, C3))
    t = jnp.exp(c_sel - w_sel * hf)
    r = 1.0 / (1.0 + t)
    return jnp.where(m2, r, T_BETA + t * r).astype(h.dtype)


# ---------------------------------------------------------------------------
# Wrapper helpers.
# ---------------------------------------------------------------------------
def _pick_width(n_main):
    """Widest lane-dense last dim that divides the 128-aligned element count."""
    for w in (1024, 512, 256, _LANE):
        if n_main % w == 0:
            return w
    return _LANE   # unreachable: n_main is a multiple of 128


def _run_slab(slab):
    rows, width = slab.shape
    itemsize = slab.dtype.itemsize
    target_rows = max(8, _TARGET_BLOCK_BYTES // (width * itemsize))

    if rows <= 8:
        tr = rows                               # full-extent block (tiny input)
    else:
        # Keep >= 4 grid steps for megacore sharding / pipeline overlap,
        # rounded up to a sublane multiple of 8 (always <= rows here).
        tr = min(target_rows, ((pl.cdiv(rows, 4) + 7) // 8) * 8)

    grid = (pl.cdiv(rows, tr),)

    return pl.pallas_call(
        _triple_sigmoid_kernel,
        out_shape=jax.ShapeDtypeStruct((rows, width), slab.dtype),
        grid_spec=pltpu.PrefetchScalarGridSpec(
            num_scalar_prefetch=0,
            grid=grid,
            in_specs=[pl.BlockSpec((tr, width), lambda i: (i, 0))],
            out_specs=pl.BlockSpec((tr, width), lambda i: (i, 0)),
        ),
        compiler_params=pltpu.CompilerParams(
            dimension_semantics=("parallel",),
            vmem_limit_bytes=_VMEM_LIMIT_BYTES,
        ),
    )(slab)


@jax.jit
def triple_sigmoid(h):
    orig_shape = h.shape
    n = h.size
    flat = h.reshape(-1)

    n_main = (n // _LANE) * _LANE
    if n_main == 0:
        # Fewer than 128 elements: not worth a kernel launch.
        return _triple_sigmoid_jnp(flat).reshape(orig_shape)

    width = _pick_width(n_main)
    main = flat if n_main == n else flat[:n_main]
    out_main = _run_slab(main.reshape(n_main // width, width)).reshape(-1)

    if n_main == n:
        return out_main.reshape(orig_shape)

    # TODO(synk): sizes not divisible by 128 take this path — the <128-element
    # ragged tail is computed in plain jnp and re-joined with one concat pass.
    out_tail = _triple_sigmoid_jnp(flat[n_main:])
    return jnp.concatenate([out_main, out_tail]).reshape(orig_shape)


# ---------------------------------------------------------------------------
# Pure-JAX reference (mirrors the PyTorch forward) for a sanity check.
# ---------------------------------------------------------------------------
def triple_sigmoid_ref(h):
    h = h.astype(jnp.float32)

    def calc_part(h, w, b):
        return jnp.exp(-w * (h - b) - B0)

    e1 = 1.0 / (1.0 + calc_part(h, W1, B1))
    e2 = 1.0 / (1.0 + calc_part(h, W2, B2))
    t3 = calc_part(h, W3, B3)
    e3 = T_BETA + t3 / (1.0 + t3)
    h1 = jnp.where(h < ALPHA, e1, 0.0)
    h2 = jnp.where(jnp.logical_and(ALPHA <= h, h < BETA), e2, 0.0)
    h3 = jnp.where(BETA <= h, e3, 0.0)
    return h1 + h2 + h3


if __name__ == "__main__":
    key = jax.random.PRNGKey(0)
    # NCHW-like input consistent with an activation used after a conv layer.
    # Scale by 300 so all three branches (h < 0, 0 <= h < 500, h >= 500) hit.
    x = jax.random.normal(key, (2, 4, 16, 16), dtype=jnp.float32) * 300.0

    y = jax.block_until_ready(triple_sigmoid(x))

    y_ref = triple_sigmoid_ref(x)
    assert y.shape == x.shape and y.dtype == x.dtype
    assert jnp.allclose(y, y_ref, atol=1e-6, rtol=1e-6)

    print("KERNEL_OK")
</pallas_src>

<mosaic_0001>
module attributes {stable_mosaic.version = 11 : i64} {
  func.func @_triple_sigmoid_kernel(%arg0: i32, %arg1: memref<2x1024xf32, #tpu.memory_space<vmem>>, %arg2: memref<2x1024xf32, #tpu.memory_space<vmem>>) attributes {dimension_semantics = [#tpu.dimension_semantics<parallel>], iteration_bounds = array<i64: 1>, scalar_prefetch = 0 : i64, scratch_operands = 0 : i64, tpu.core_type = #tpu.core_type<tc>, window_params = [{transform_indices = @transform_0, window_bounds = array<i64: 2, 1024>}, {transform_indices = @transform_1, window_bounds = array<i64: 2, 1024>}]} {
    %c0 = arith.constant 0 : index
    %c0_0 = arith.constant 0 : index
    %0 = vector.load %arg1[%c0, %c0_0] : memref<2x1024xf32, #tpu.memory_space<vmem>>, vector<2x1024xf32>
    %cst = arith.constant 0.000000e+00 : f32
    %1 = vector.broadcast %cst : f32 to vector<2x1024xf32>
    %2 = arith.cmpf olt, %0, %1 : vector<2x1024xf32>
    %cst_1 = arith.constant 5.000000e+02 : f32
    %3 = vector.broadcast %cst_1 : f32 to vector<2x1024xf32>
    %4 = arith.cmpf olt, %0, %3 : vector<2x1024xf32>
    %cst_2 = arith.constant 1.000000e-01 : f32
    %cst_3 = arith.constant 1.000000e-03 : f32
    %5 = vector.broadcast %cst_2 : f32 to vector<2x1024xf32>
    %6 = vector.broadcast %cst_3 : f32 to vector<2x1024xf32>
    %7 = arith.select %4, %5, %6 : vector<2x1024xi1>, vector<2x1024xf32>
    %cst_4 = arith.constant 5.000000e-03 : f32
    %8 = vector.broadcast %cst_4 : f32 to vector<2x1024xf32>
    %9 = arith.select %2, %8, %7 : vector<2x1024xi1>, vector<2x1024xf32>
    %cst_5 = arith.constant -1.500000e+00 : f32
    %cst_6 = arith.constant -1.000000e+00 : f32
    %10 = vector.broadcast %cst_5 : f32 to vector<2x1024xf32>
    %11 = vector.broadcast %cst_6 : f32 to vector<2x1024xf32>
    %12 = arith.select %4, %10, %11 : vector<2x1024xi1>, vector<2x1024xf32>
    %cst_7 = arith.constant -1.500000e+00 : f32
    %13 = vector.broadcast %cst_7 : f32 to vector<2x1024xf32>
    %14 = arith.select %2, %13, %12 : vector<2x1024xi1>, vector<2x1024xf32>
    %15 = arith.mulf %9, %0 : vector<2x1024xf32>
    %16 = arith.subf %14, %15 : vector<2x1024xf32>
    %17 = math.exp %16 : vector<2x1024xf32>
    %cst_8 = arith.constant 1.000000e+00 : f32
    %18 = vector.broadcast %cst_8 : f32 to vector<2x1024xf32>
    %19 = arith.addf %18, %17 : vector<2x1024xf32>
    %20 = tpu.reciprocal %19 : vector<2x1024xf32> -> vector<2x1024xf32>
    %21 = arith.mulf %17, %20 : vector<2x1024xf32>
    %cst_9 = arith.constant 0.817574501 : f32
    %22 = vector.broadcast %cst_9 : f32 to vector<2x1024xf32>
    %23 = arith.addf %22, %21 : vector<2x1024xf32>
    %24 = arith.select %4, %20, %23 : vector<2x1024xi1>, vector<2x1024xf32>
    %c0_10 = arith.constant 0 : index
    %c0_11 = arith.constant 0 : index
    %25 = vector.load %arg2[%c0_10, %c0_11] : memref<2x1024xf32, #tpu.memory_space<vmem>>, vector<2x1024xf32>
    tpu.vector_store %arg2[%c0_10, %c0_11], %24 {strides = array<i32>} : memref<2x1024xf32, #tpu.memory_space<vmem>>, vector<2x1024xf32>,
    return
  }
  func.func @transform_0(%arg0: i32) -> (i32, i32) {
    %c0_i32 = arith.constant 0 : i32
    %c0_i32_0 = arith.constant 0 : i32
    return %arg0, %c0_i32 : i32, i32
  }
  func.func @transform_1(%arg0: i32) -> (i32, i32) {
    %c0_i32 = arith.constant 0 : i32
    %c0_i32_0 = arith.constant 0 : i32
    return %arg0, %c0_i32 : i32, i32
  }
}

</mosaic_0001>

<bundles_post_ra>
// kernel: triple_sigmoid.1
= control target key start
LH: loop header
LB: loop body
LE: loop exit
PB: predicated region body
PF: predicated region fallthrough
CT: control target
= control target key end

     0   :  { %v56_v2 = vmov 0.001   ;;  %v57_v4 = vmov -1.0   ;;  %s86_s0 = inlined_call_operand.vmem [shape: f32[2,1024], index: 0, kind: input, shape index: {}]   ;;  %s87_s1 = inlined_call_operand.vmem [shape: f32[2,1024], index: 1, kind: output, shape index: {}]  }
   0x1   :  { %v8_v0 = vld [vmem:[%s86_s0] sm:$0xff]  ;;  %v9_v1 = vld [vmem:[%s86_s0 + $0x8] sm:$0xff] }
   0x2   :  { %vm10_vm0 = vcmp.lt.f32.partialorder %v8_v0, 0.0  ;;  %vm12_vm1 = vcmp.lt.f32.partialorder %v8_v0, 500.0  ;;  %vm11_vm2 = vcmp.lt.f32.partialorder %v9_v1, 0.0  ;;  %vm13_vm3 = vcmp.lt.f32.partialorder %v9_v1, 500.0 }
   0x3   :  { %v14_v3 = vsel %vm12_vm1, 0.1, %v56_v2  ;;  %v18_v5 = vsel %vm12_vm1, -1.5, %v57_v4  ;;  %v15_v6 = vsel %vm13_vm3, 0.1, %v56_v2  ;;  %v19_v7 = vsel %vm13_vm3, -1.5, %v57_v4 }
   0x4   :  { %v16_v8 = vsel %vm10_vm0, 0.005, %v14_v3  ;;  %v20_v9 = vsel %vm10_vm0, -1.5, %v18_v5  ;;  %v17_v10 = vsel %vm11_vm2, 0.005, %v15_v6  ;;  %v21_v11 = vsel %vm11_vm2, -1.5, %v19_v7 }
   0x5   :  { %v22_v12 = vmul.f32 %v16_v8, %v8_v0  ;;  %v23_v13 = vmul.f32 %v17_v10, %v9_v1 }
   0x7   :  { %v24_v14 = vsub.f32 %v20_v9, %v22_v12  ;;  %v25_v15 = vsub.f32 %v21_v11, %v23_v13 }
   0x9   :  { %v26_v16 = vmul.f32 1.442695, %v24_v14  ;;  %v28_v17 = vmul.f32 1.442695, %v25_v15 }
   0xb   :  { %48 = vpow2.f32 %v26_v16 }
   0xc   :  { %50 = vpow2.f32 %v28_v17 }
  0x18   :  { %v49_v18 = vpop.eup %48 }
  0x19   :  { %v51_v19 = vpop.eup %50  ;;  %v30_v20 = vadd.f32 1.0, %v49_v18 }
  0x1a   :  { %v31_v21 = vadd.f32 1.0, %v51_v19 }
  0x1b   :  { %52 = vrcp.f32 %v30_v20 }
  0x1c   :  { %54 = vrcp.f32 %v31_v21 }
  0x28   :  { %v53_v22 = vpop.eup %52 }
  0x29   :  { %v55_v23 = vpop.eup %54  ;;  %v34_v24 = vmul.f32 %v53_v22, %v49_v18 }
  0x2a   :  { %v35_v25 = vmul.f32 %v55_v23, %v51_v19 }
  0x2b   :  { %v36_v26 = vadd.f32 0.8175745, %v34_v24 }
  0x2c   :  { %v37_v27 = vadd.f32 0.8175745, %v35_v25 }
  0x2d   :  { %v38_v28 = vsel %vm12_vm1, %v53_v22, %v36_v26 }
  0x2e   :  { %40 = vst [vmem:[%s87_s1] sm:$0xff] %v38_v28  ;;  %v39_v29 = vsel %vm13_vm3, %v55_v23, %v37_v27 }
  0x2f   :  { %41 = vst [vmem:[%s87_s1 + $0x8] sm:$0xff] %v39_v29 }

</bundles_post_ra>
